<compile_context>
chip_gen: v5e
topology: v5e:2x2
jax: 0.10.0
libtpu: 0.0.40
codegen_flags: <defaults>
</compile_context>

<pallas_src>
import functools

import jax
import jax.numpy as jnp
from jax.experimental import pallas as pl
from jax.experimental.pallas import tpu as pltpu


def _locked_dropout_kernel(bits_ref, x_ref, o_ref, *, threshold, scale):
    # bits_ref: (1, tile_n) int32 uniform random bits in [0, 2**31).
    # x_ref / o_ref: (tile_t, tile_n) tile of the (time-major) input / output.
    #
    # The bits block index is constant along the T grid axis, so every
    # time-step sees the identical mask (locked dropout).
    keep = bits_ref[...] < jnp.int32(threshold)                 # 1 compare
    mask = jnp.where(keep,                                      # 1 select, x.dtype
                     jnp.asarray(scale, dtype=x_ref.dtype),
                     jnp.asarray(0, dtype=x_ref.dtype))
    # (1, tile_n) mask broadcasts over the (tile_t, tile_n) tile.
    o_ref[...] = x_ref[...] * mask


def _vmem_limit_bytes():
    """Scoped-VMEM limit derived from the chip, with a safe fallback."""
    cap = None
    try:
        cap = getattr(pltpu.get_tpu_info(), "vmem_capacity_bytes", None)
    except Exception:
        cap = None
    if not cap:
        cap = 64 << 20  # conservative: v7x physical VMEM per TensorCore
    # Leave headroom under physical VMEM; 48 MiB is comfortably inside
    # v5e/v6e's 128 MiB and v7x's 64 MiB.
    return int(min(48 << 20, (cap * 3) // 4))


def _choose_tiles(T, N_pad, itemsize, vmem_limit):
    """Pick (tile_t, tile_n) from the chip's VMEM budget.

    Footprint model: in-tile and out-tile are each double-buffered (4 buffers)
    plus a tiny double-buffered (1, tile_n) bits block; target ~60% of the
    scoped limit for the 4 big buffers.
    """
    sublane = max(8, 32 // itemsize)          # 8 f32, 16 bf16, 32 int8/fp8
    tile_budget = int(0.6 * vmem_limit) // 4  # bytes per buffer

    # Lane tiling: only split N when even one sublane-group of rows is too big.
    row_bytes = N_pad * itemsize
    if row_bytes * sublane > tile_budget:
        tile_n = (tile_budget // (sublane * itemsize)) // 128 * 128
        tile_n = min(N_pad, max(128, tile_n))
    else:
        tile_n = N_pad

    # Row tiling: biggest sublane-aligned row count that fits the budget.
    rows = tile_budget // max(1, tile_n * itemsize)
    rows = max(sublane, (rows // sublane) * sublane)

    # Cap so the T grid has >= 2 steps when possible (megacore sharding on
    # v7x: each TensorCore has its own HBM path, so 2+ steps ~doubles BW).
    if T > sublane:
        half = -(-pl.cdiv(T, 2) // sublane) * sublane  # ceil(T/2) -> sublane mult
        rows = min(rows, max(sublane, half))

    tile_t = T if rows >= T else rows
    return tile_t, tile_n


def locked_dropout(x, key, dropout=0.5, training=True, donate=False):
    """Pallas LockedDropout.

    x:      (T, B, H) array (time-major, like the PyTorch module).
    key:    jax.random PRNG key used to sample the (B, H) mask.
    donate: set True only if the caller donates x (enables in-place aliasing).
    """
    if (not training) or (dropout == 0.0):
        return x
    if not (0.0 <= dropout < 1.0):
        raise ValueError(f"dropout must be in [0, 1), got {dropout}")

    T, B, H = x.shape
    N = B * H
    itemsize = jnp.dtype(x.dtype).itemsize
    keep_prob = 1.0 - float(dropout)
    scale = 1.0 / keep_prob
    # Integer keep-threshold: P(bits < threshold) == keep_prob for bits uniform
    # over [0, 2**31). The clamp/rounding quantizes p at 2**-31 granularity
    # (negligible bias); do NOT "fix" the clamp — it prevents int32 overflow.
    threshold = min(int(round(keep_prob * float(2 ** 31))), 2 ** 31 - 1)

    # Lane-dense 2-D layout (T, B*H); pad lanes up to a multiple of 128 so the
    # output stores are unmasked. The mask is per-(b, h), so flattening B and H
    # preserves locked-dropout semantics exactly; the pad is sliced off below.
    N_pad = -(-N // 128) * 128
    x2 = x.reshape(T, N)
    if N_pad != N:
        x2 = jnp.pad(x2, ((0, 0), (0, N_pad - N)))

    # Raw random bits for the mask, drawn once in the wrapper (tiny: (1, N_pad)).
    bits = (jax.random.bits(key, (1, N_pad), dtype=jnp.uint32) >> 1).astype(jnp.int32)

    vmem_limit = _vmem_limit_bytes()
    tile_t, tile_n = _choose_tiles(T, N_pad, itemsize, vmem_limit)
    grid = (pl.cdiv(T, tile_t), pl.cdiv(N_pad, tile_n))

    kernel = functools.partial(_locked_dropout_kernel,
                               threshold=threshold, scale=scale)

    cost = pl.CostEstimate(
        flops=2 * T * N_pad,                       # select + multiply
        transcendentals=0,
        bytes_accessed=2 * T * N_pad * itemsize + N_pad * 4,
    )

    out2 = pl.pallas_call(
        kernel,
        out_shape=jax.ShapeDtypeStruct((T, N_pad), x.dtype),
        grid=grid,
        in_specs=[
            # Same bits block for every T tile -> locked mask across time.
            pl.BlockSpec((1, tile_n), lambda t, n: (0, n)),
            pl.BlockSpec((tile_t, tile_n), lambda t, n: (t, n)),
        ],
        out_specs=pl.BlockSpec((tile_t, tile_n), lambda t, n: (t, n)),
        compiler_params=pltpu.CompilerParams(
            dimension_semantics=("parallel", "parallel"),
            vmem_limit_bytes=vmem_limit,
        ),
        cost_estimate=cost,
        input_output_aliases=({1: 0} if donate else {}),
    )(bits, x2)

    if N_pad != N:
        out2 = out2[:, :N]
    return out2.reshape(T, B, H)


def _check(x, key, dropout):
    out = jax.block_until_ready(locked_dropout(x, key, dropout=dropout,
                                               training=True))
    scale = 1.0 / (1.0 - dropout)
    xf = x.astype(jnp.float32)
    of = out.astype(jnp.float32)

    # 1) each output element is either 0 or x / (1 - p)
    ratio = jnp.where(xf != 0, of / xf, 0.0)
    ok_values = bool(
        jnp.all((jnp.abs(ratio) < 1e-6) | (jnp.abs(ratio - scale) < 1e-2))
    )

    # 2) the mask is identical across the time axis (locked)
    m0 = out[0] != 0
    ok_locked = bool(jnp.all(jnp.all(out != 0, axis=0) == m0)
                     & jnp.all(jnp.all(out == 0, axis=0) == ~m0))

    # 3) mask is non-trivial (some kept, some dropped)
    kept_frac = float(jnp.mean(m0.astype(jnp.float32)))
    ok_nontrivial = 0.0 < kept_frac < 1.0

    return ok_values, ok_locked, ok_nontrivial


if __name__ == "__main__":
    root = jax.random.PRNGKey(0)
    key_x, key_mask, key_x2, key_mask2 = jax.random.split(root, 4)

    # Primary case: seq=8, batch=4, hidden=32 -> N = 128 lanes (no padding).
    T, B, H = 8, 4, 32
    x = jax.random.normal(key_x, (T, B, H), dtype=jnp.float32)
    dropout = 0.5
    ok_values, ok_locked, ok_nontrivial = _check(x, key_mask, dropout)

    # Padding path: hidden such that B*H is not a multiple of 128.
    xp = jax.random.normal(key_x2, (8, 2, 10), dtype=jnp.float32)
    ok_values_p, ok_locked_p, _ = _check(xp, key_mask2, dropout)

    # Eval / dropout=0 paths are identity.
    ok_eval = bool(jnp.all(locked_dropout(x, key_mask, dropout=dropout,
                                          training=False) == x))
    ok_zero = bool(jnp.all(locked_dropout(x, key_mask, dropout=0.0,
                                          training=True) == x))

    assert (ok_values and ok_locked and ok_nontrivial and ok_values_p
            and ok_locked_p and ok_eval and ok_zero), (
        ok_values, ok_locked, ok_nontrivial, ok_values_p, ok_locked_p,
        ok_eval, ok_zero)
    print("KERNEL_OK")
</pallas_src>

<mosaic_0001>
module attributes {stable_mosaic.version = 11 : i64} {
  func.func @_locked_dropout_kernel(%arg0: i32, %arg1: i32, %arg2: memref<1x128xi32, #tpu.memory_space<vmem>>, %arg3: memref<8x128xf32, #tpu.memory_space<vmem>>, %arg4: memref<8x128xf32, #tpu.memory_space<vmem>>) attributes {dimension_semantics = [#tpu.dimension_semantics<parallel>, #tpu.dimension_semantics<parallel>], iteration_bounds = array<i64: 1, 1>, scalar_prefetch = 0 : i64, scratch_operands = 0 : i64, tpu.core_type = #tpu.core_type<tc>, window_params = [{transform_indices = @transform_0, window_bounds = array<i64: 1, 128>}, {transform_indices = @transform_1, window_bounds = array<i64: 8, 128>}, {transform_indices = @transform_2, window_bounds = array<i64: 8, 128>}]} {
    %c0 = arith.constant 0 : index
    %c0_0 = arith.constant 0 : index
    %0 = vector.load %arg2[%c0, %c0_0] : memref<1x128xi32, #tpu.memory_space<vmem>>, vector<1x128xi32>
    %c1073741824_i32 = arith.constant 1073741824 : i32
    %1 = vector.broadcast %c1073741824_i32 : i32 to vector<1x128xi32>
    %2 = arith.cmpi slt, %0, %1 : vector<1x128xi32>
    %cst = arith.constant 2.000000e+00 : f32
    %cst_1 = arith.constant 0.000000e+00 : f32
    %3 = vector.broadcast %cst : f32 to vector<1x128xf32>
    %4 = vector.broadcast %cst_1 : f32 to vector<1x128xf32>
    %5 = arith.select %2, %3, %4 : vector<1x128xi1>, vector<1x128xf32>
    %c0_2 = arith.constant 0 : index
    %c0_3 = arith.constant 0 : index
    %6 = vector.load %arg3[%c0_2, %c0_3] : memref<8x128xf32, #tpu.memory_space<vmem>>, vector<8x128xf32>
    %7 = vector.broadcast %5 : vector<1x128xf32> to vector<8x128xf32>
    %8 = arith.mulf %6, %7 : vector<8x128xf32>
    %c0_4 = arith.constant 0 : index
    %c0_5 = arith.constant 0 : index
    %9 = vector.load %arg4[%c0_4, %c0_5] : memref<8x128xf32, #tpu.memory_space<vmem>>, vector<8x128xf32>
    tpu.vector_store %arg4[%c0_4, %c0_5], %8 {strides = array<i32>} : memref<8x128xf32, #tpu.memory_space<vmem>>, vector<8x128xf32>,
    return
  }
  func.func @transform_0(%arg0: i32, %arg1: i32) -> (i32, i32) {
    %c0_i32 = arith.constant 0 : i32
    %c0_i32_0 = arith.constant 0 : i32
    return %c0_i32, %arg1 : i32, i32
  }
  func.func @transform_1(%arg0: i32, %arg1: i32) -> (i32, i32) {
    %c0_i32 = arith.constant 0 : i32
    return %arg0, %arg1 : i32, i32
  }
  func.func @transform_2(%arg0: i32, %arg1: i32) -> (i32, i32) {
    %c0_i32 = arith.constant 0 : i32
    return %arg0, %arg1 : i32, i32
  }
}

</mosaic_0001>

<bundles_post_ra>
// kernel: tpu_custom_call.1
= control target key start
LH: loop header
LB: loop body
LE: loop exit
PB: predicated region body
PF: predicated region fallthrough
CT: control target
= control target key end

     0   :  { %7 = vsyncpa [#allocation3], 0  ;;  %s177_s0 = inlined_call_operand.hbm [shape: s32[1,128], index: 0, kind: input, shape index: {}]   ;;  %s178_s1 = inlined_call_operand.hbm [shape: f32[8,128], index: 1, kind: input, shape index: {}]   ;;  %s179_s2 = inlined_call_operand.hbm [shape: f32[8,128], index: 2, kind: output, shape index: {}]  }
   0x1   :  { %8 = vsyncpa [#allocation6], 0 }
   0x2   :  { %9 = vsyncpa [#allocation4], 0  ;;  %s15_s11 = sshll.u32 %s177_s0, 4  ;;  %s149_s12 = smov [#allocation2]   ;;  %s16_s11 = int_to_ptr.hbm [resolvable:$true] %s15_s11 }
   0x3   :  { %s17_s13 = sshll.u32 %s149_s12, 4  ;;  %s26_s16 = sshll.u32 %s178_s1, 4  ;;  %s18_s13 = int_to_ptr.vmem [resolvable:$true] %s17_s13  ;;  %s27_s16 = int_to_ptr.hbm [resolvable:$true] %s26_s16 }
   0x4   :  { %20 = dma.hbm_to_vmem [thread:$0]  %s16_s11, 16, %s18_s13, [#allocation3]  }
   0x5   :  { %s150_s17 = smov [#allocation5]  }
   0x6   :  { %s28_s18 = sshll.u32 %s150_s17, 4  ;;  %s29_s18 = int_to_ptr.vmem [resolvable:$true] %s28_s18 }
   0x7   :  { %31 = dma.hbm_to_vmem [thread:$0]  %s27_s16, 128, %s29_s18, [#allocation6]  }
   0x8   :  { %143 = dma.done.wait [#allocation3], 16  }
   0x9   :  { %144 = vsyncadd [#allocation3], 4294967280 }
   0xa   :  { %145 = dma.done.wait [#allocation6], 128  }
   0xb   :  { %146 = vsyncadd [#allocation6], 4294967168  ;;  %v40_v0 = vld [vmem:[#allocation2] sm:$0x1]  ;;  %v151_v1 = vmov 0.0   ;;  %v43_v3 = vld [vmem:[#allocation5] sm:$0xff] }
   0xc   :  { %vm41_vm0 = vcmp.lt.s32.totalorder %v40_v0, 1073741824  ;;  %s152_s0 = smov [#allocation7]   ;;  %s56_s1 = sshll.u32 %s179_s2, 4  ;;  %s57_s1 = int_to_ptr.hbm [resolvable:$true] %s56_s1 }
   0xd   :  { %v42_v2 = vsel %vm41_vm0, 2.0, %v151_v1  ;;  %s54_s19 = sshll.u32 %s152_s0, 4  ;;  %s55_s19 = int_to_ptr.vmem [resolvable:$true] %s54_s19 }
   0xe   :  { %v45_v4 = vperm.slane %v42_v2, 0 }
  0x10   :  { %v47_v5 = vmul.f32 %v45_v4, %v43_v3 }
  0x12   :  { %48 = vst [vmem:[#allocation7] sm:$0xff] %v47_v5 }
  0x13   :  { %59 = dma.vmem_to_hbm [thread:$0]  %s55_s19, 128, %s57_s1, [#allocation4]  }
  0x14   :  { %147 = dma.done.wait [#allocation4], 128  }
  0x15   :  { %148 = vsyncadd [#allocation4], 4294967168 }
  0x16   :  { %64 = vsyncpa [#allocation3], 1 }
  0x17   :  { %65 = vsyncpa [#allocation6], 1 }
  0x18   :  { %66 = vsyncpa [#allocation4], 1 }

</bundles_post_ra>
